<compile_context>
chip_gen: v5e
topology: v5e:2x2
jax: 0.10.0
libtpu: 0.0.40
codegen_flags: <defaults>
</compile_context>

<pallas_src>
import math

import jax
import jax.numpy as jnp
from jax.experimental import pallas as pl
from jax.experimental.pallas import tpu as pltpu


# ----------------------------------------------------------------------------
# Fused MLP kernel factory.
# refs layout: (x, w1, b1, w2, b2, ..., wn, bn, out)
# The last layer's w/b/out refs are column tiles selected by the grid index;
# everything else is a full, grid-invariant block resident in VMEM.
# ----------------------------------------------------------------------------
def _make_mlp_kernel(n_layers):
    def kernel(*refs):
        x_ref = refs[0]
        o_ref = refs[-1]
        h = x_ref[...]
        for i in range(n_layers):
            w = refs[1 + 2 * i][...]
            b = refs[2 + 2 * i][...]
            h = jnp.dot(h, w, preferred_element_type=jnp.float32) + b
            if i < n_layers - 1:          # ReLU on all but the last layer
                h = jnp.maximum(h, 0.0)
        o_ref[...] = h.astype(o_ref.dtype)

    return kernel


# ----------------------------------------------------------------------------
# Pick the last-layer output-column tile width under a VMEM byte budget.
# Tile is a multiple of 128 (lane-dense stores) that divides N, or the full N
# when N is small / not lane-aligned (full-dim blocks are always legal).
# ----------------------------------------------------------------------------
def _pick_last_tile(n_out, k_in, m_rows, budget_bytes=16 << 20):
    if n_out % 128 != 0:
        return n_out  # single full-width tile

    def tile_bytes(t):  # W tile + bias tile + out tile, double-buffered, f32
        return 2 * 4 * (k_in * t + t + m_rows * t)

    tn = n_out
    while tn > 128 and (n_out % tn != 0 or tile_bytes(tn) > budget_bytes):
        tn -= 128
    return tn


# ----------------------------------------------------------------------------
# Forward pass: equivalent to CondVariationalDecoder.forward(x).
# x: (M, decoder_dims[0]); params: list of (W (in,out), b (1,out)).
# ----------------------------------------------------------------------------
def cond_variational_decoder_forward(x, params):
    n_layers = len(params)
    M = x.shape[0]
    k_last, N = params[-1][0].shape

    tn = _pick_last_tile(N, k_last, M)
    grid = (N // tn,)

    def invariant(shape):
        return pl.BlockSpec(shape, lambda j, _s=shape: tuple(0 for _ in _s))

    in_specs = [invariant(x.shape)]
    for i, (w, b) in enumerate(params):
        if i < n_layers - 1:
            in_specs += [invariant(w.shape), invariant(b.shape)]
        else:
            in_specs += [
                pl.BlockSpec((w.shape[0], tn), lambda j: (0, j)),
                pl.BlockSpec((1, tn), lambda j: (0, j)),
            ]
    out_spec = pl.BlockSpec((M, tn), lambda j: (0, j))

    # Explicit VMEM budget (grid-invariant operands + double-buffered tiles).
    fixed_bytes = 4 * (x.size + sum(w.size + b.size for w, b in params[:-1]))
    tile_bytes = 2 * 4 * (k_last * tn + tn + M * tn)
    vmem_limit = min(max(2 * fixed_bytes + tile_bytes + (4 << 20), 16 << 20),
                     48 << 20)

    operands = [x]
    for w, b in params:
        operands += [w, b]

    return pl.pallas_call(
        _make_mlp_kernel(n_layers),
        out_shape=jax.ShapeDtypeStruct((M, N), jnp.float32),
        grid_spec=pltpu.PrefetchScalarGridSpec(
            num_scalar_prefetch=0,
            grid=grid,
            in_specs=in_specs,
            out_specs=out_spec,
        ),
        compiler_params=pltpu.CompilerParams(
            dimension_semantics=("parallel",),
            vmem_limit_bytes=vmem_limit,
        ),
    )(*operands)


# ----------------------------------------------------------------------------
# Deterministic parameter init: xavier_uniform weights, zero bias.
# Weights stored as (in, out) so the kernel computes x @ W.
# ----------------------------------------------------------------------------
def init_decoder_params(key, dims):
    params = []
    for i in range(len(dims) - 1):
        fan_in, fan_out = dims[i], dims[i + 1]
        key, sub = jax.random.split(key)
        bound = math.sqrt(6.0 / (fan_in + fan_out))
        w = jax.random.uniform(sub, (fan_in, fan_out),
                               minval=-bound, maxval=bound, dtype=jnp.float32)
        b = jnp.zeros((1, fan_out), dtype=jnp.float32)
        params.append((w, b))
    return params


if __name__ == "__main__":
    # Small shapes consistent with the module: batch=2, latent=32,
    # hidden dims [64, 128], output 1024 (= 4*16*16 flattened image).
    batch = 2
    decoder_dims = [32, 64, 128, 1024]

    key = jax.random.PRNGKey(0)
    k_x, k_p = jax.random.split(key)

    x = jax.random.normal(k_x, (batch, decoder_dims[0]), dtype=jnp.float32)
    params = init_decoder_params(k_p, decoder_dims)

    out = cond_variational_decoder_forward(x, params)
    out = jax.block_until_ready(out)

    # Pure-JAX reference of the same forward pass.
    ref = x
    for i, (w, b) in enumerate(params):
        ref = jnp.dot(ref, w, precision=jax.lax.Precision.HIGHEST) + b
        if i < len(params) - 1:
            ref = jnp.maximum(ref, 0.0)

    assert out.shape == (batch, decoder_dims[-1]), out.shape
    assert jnp.all(jnp.isfinite(out))
    max_err = float(jnp.max(jnp.abs(out - ref)))
    assert jnp.allclose(out, ref, atol=5e-3, rtol=5e-3), max_err
    print("KERNEL_OK")
</pallas_src>

<mosaic_0001>
module attributes {stable_mosaic.version = 11 : i64} {
  func.func @kernel(%arg0: i32, %arg1: memref<2x32xf32, #tpu.memory_space<vmem>>, %arg2: memref<32x64xf32, #tpu.memory_space<vmem>>, %arg3: memref<1x64xf32, #tpu.memory_space<vmem>>, %arg4: memref<64x128xf32, #tpu.memory_space<vmem>>, %arg5: memref<1x128xf32, #tpu.memory_space<vmem>>, %arg6: memref<128x1024xf32, #tpu.memory_space<vmem>>, %arg7: memref<1x1024xf32, #tpu.memory_space<vmem>>, %arg8: memref<2x1024xf32, #tpu.memory_space<vmem>>) attributes {dimension_semantics = [#tpu.dimension_semantics<parallel>], iteration_bounds = array<i64: 1>, scalar_prefetch = 0 : i64, scratch_operands = 0 : i64, tpu.core_type = #tpu.core_type<tc>, window_params = [{pipeline_mode = #tpu.pipeline_mode<synchronous>, transform_indices = @transform_0, window_bounds = array<i64: 2, 32>}, {pipeline_mode = #tpu.pipeline_mode<synchronous>, transform_indices = @transform_1, window_bounds = array<i64: 32, 64>}, {pipeline_mode = #tpu.pipeline_mode<synchronous>, transform_indices = @transform_2, window_bounds = array<i64: 1, 64>}, {pipeline_mode = #tpu.pipeline_mode<synchronous>, transform_indices = @transform_3, window_bounds = array<i64: 64, 128>}, {pipeline_mode = #tpu.pipeline_mode<synchronous>, transform_indices = @transform_4, window_bounds = array<i64: 1, 128>}, {transform_indices = @transform_5, window_bounds = array<i64: 128, 1024>}, {transform_indices = @transform_6, window_bounds = array<i64: 1, 1024>}, {transform_indices = @transform_7, window_bounds = array<i64: 2, 1024>}]} {
    %c0 = arith.constant 0 : index
    %c0_0 = arith.constant 0 : index
    %0 = vector.load %arg1[%c0, %c0_0] : memref<2x32xf32, #tpu.memory_space<vmem>>, vector<2x32xf32>
    %c0_1 = arith.constant 0 : index
    %c0_2 = arith.constant 0 : index
    %1 = vector.load %arg2[%c0_1, %c0_2] : memref<32x64xf32, #tpu.memory_space<vmem>>, vector<32x64xf32>
    %c0_3 = arith.constant 0 : index
    %c0_4 = arith.constant 0 : index
    %2 = vector.load %arg3[%c0_3, %c0_4] : memref<1x64xf32, #tpu.memory_space<vmem>>, vector<1x64xf32>
    %cst = arith.constant dense<0.000000e+00> : vector<2x64xf32>
    %3 = tpu.matmul %0, %1, %cst {dimension_numbers = #tpu.dot_dimension_numbers<[1], [0], [0], [1], [0, 0, 1, 1], [], []>} : vector<2x32xf32>, vector<32x64xf32>, vector<2x64xf32> -> vector<2x64xf32>
    %4 = vector.broadcast %2 : vector<1x64xf32> to vector<2x64xf32>
    %5 = arith.addf %3, %4 : vector<2x64xf32>
    %cst_5 = arith.constant 0.000000e+00 : f32
    %6 = vector.broadcast %cst_5 : f32 to vector<2x64xf32>
    %7 = arith.maximumf %5, %6 : vector<2x64xf32>
    %c0_6 = arith.constant 0 : index
    %c0_7 = arith.constant 0 : index
    %8 = vector.load %arg4[%c0_6, %c0_7] : memref<64x128xf32, #tpu.memory_space<vmem>>, vector<64x128xf32>
    %c0_8 = arith.constant 0 : index
    %c0_9 = arith.constant 0 : index
    %9 = vector.load %arg5[%c0_8, %c0_9] : memref<1x128xf32, #tpu.memory_space<vmem>>, vector<1x128xf32>
    %cst_10 = arith.constant dense<0.000000e+00> : vector<2x128xf32>
    %10 = tpu.matmul %7, %8, %cst_10 {dimension_numbers = #tpu.dot_dimension_numbers<[1], [0], [0], [1], [0, 0, 1, 1], [], []>} : vector<2x64xf32>, vector<64x128xf32>, vector<2x128xf32> -> vector<2x128xf32>
    %11 = vector.broadcast %9 : vector<1x128xf32> to vector<2x128xf32>
    %12 = arith.addf %10, %11 : vector<2x128xf32>
    %cst_11 = arith.constant 0.000000e+00 : f32
    %13 = vector.broadcast %cst_11 : f32 to vector<2x128xf32>
    %14 = arith.maximumf %12, %13 : vector<2x128xf32>
    %c0_12 = arith.constant 0 : index
    %c0_13 = arith.constant 0 : index
    %15 = vector.load %arg6[%c0_12, %c0_13] : memref<128x1024xf32, #tpu.memory_space<vmem>>, vector<128x1024xf32>
    %c0_14 = arith.constant 0 : index
    %c0_15 = arith.constant 0 : index
    %16 = vector.load %arg7[%c0_14, %c0_15] : memref<1x1024xf32, #tpu.memory_space<vmem>>, vector<1x1024xf32>
    %cst_16 = arith.constant dense<0.000000e+00> : vector<2x1024xf32>
    %17 = tpu.matmul %14, %15, %cst_16 {dimension_numbers = #tpu.dot_dimension_numbers<[1], [0], [0], [1], [0, 0, 1, 1], [], []>} : vector<2x128xf32>, vector<128x1024xf32>, vector<2x1024xf32> -> vector<2x1024xf32>
    %18 = vector.broadcast %16 : vector<1x1024xf32> to vector<2x1024xf32>
    %19 = arith.addf %17, %18 : vector<2x1024xf32>
    %c0_17 = arith.constant 0 : index
    %c0_18 = arith.constant 0 : index
    %20 = vector.load %arg8[%c0_17, %c0_18] : memref<2x1024xf32, #tpu.memory_space<vmem>>, vector<2x1024xf32>
    tpu.vector_store %arg8[%c0_17, %c0_18], %19 {strides = array<i32>} : memref<2x1024xf32, #tpu.memory_space<vmem>>, vector<2x1024xf32>,
    return
  }
  func.func @transform_0(%arg0: i32) -> (i32, i32) {
    %c0_i32 = arith.constant 0 : i32
    %c0_i32_0 = arith.constant 0 : i32
    %c0_i32_1 = arith.constant 0 : i32
    return %c0_i32, %c0_i32_0 : i32, i32
  }
  func.func @transform_1(%arg0: i32) -> (i32, i32) {
    %c0_i32 = arith.constant 0 : i32
    %c0_i32_0 = arith.constant 0 : i32
    %c0_i32_1 = arith.constant 0 : i32
    return %c0_i32, %c0_i32_0 : i32, i32
  }
  func.func @transform_2(%arg0: i32) -> (i32, i32) {
    %c0_i32 = arith.constant 0 : i32
    %c0_i32_0 = arith.constant 0 : i32
    %c0_i32_1 = arith.constant 0 : i32
    return %c0_i32, %c0_i32_0 : i32, i32
  }
  func.func @transform_3(%arg0: i32) -> (i32, i32) {
    %c0_i32 = arith.constant 0 : i32
    %c0_i32_0 = arith.constant 0 : i32
    %c0_i32_1 = arith.constant 0 : i32
    return %c0_i32, %c0_i32_0 : i32, i32
  }
  func.func @transform_4(%arg0: i32) -> (i32, i32) {
    %c0_i32 = arith.constant 0 : i32
    %c0_i32_0 = arith.constant 0 : i32
    %c0_i32_1 = arith.constant 0 : i32
    return %c0_i32, %c0_i32_0 : i32, i32
  }
  func.func @transform_5(%arg0: i32) -> (i32, i32) {
    %c0_i32 = arith.constant 0 : i32
    %c0_i32_0 = arith.constant 0 : i32
    return %c0_i32, %arg0 : i32, i32
  }
  func.func @transform_6(%arg0: i32) -> (i32, i32) {
    %c0_i32 = arith.constant 0 : i32
    %c0_i32_0 = arith.constant 0 : i32
    return %c0_i32, %arg0 : i32, i32
  }
  func.func @transform_7(%arg0: i32) -> (i32, i32) {
    %c0_i32 = arith.constant 0 : i32
    %c0_i32_0 = arith.constant 0 : i32
    return %c0_i32, %arg0 : i32, i32
  }
}

</mosaic_0001>

<bundles_post_ra>
// kernel: tpu_custom_call.1
= control target key start
LH: loop header
LB: loop body
LE: loop exit
PB: predicated region body
PF: predicated region fallthrough
CT: control target
= control target key end

     0   :  { %12 = vsyncpa [#allocation3], 0  ;;  %s770_s0 = inlined_call_operand.hbm [shape: f32[2,32], index: 0, kind: input, shape index: {}]   ;;  %s771_s1 = inlined_call_operand.hbm [shape: f32[32,64], index: 1, kind: input, shape index: {}]   ;;  %s772_s2 = inlined_call_operand.vmem [shape: f32[1,64], index: 2, kind: input, shape index: {}]   ;;  %s773_s3 = inlined_call_operand.hbm [shape: f32[64,128], index: 3, kind: input, shape index: {}]   ;;  %s774_s4 = inlined_call_operand.vmem [shape: f32[1,128], index: 4, kind: input, shape index: {}]   ;;  %s775_s5 = inlined_call_operand.hbm [shape: f32[128,1024], index: 5, kind: input, shape index: {}]   ;;  %s776_s6 = inlined_call_operand.hbm [shape: f32[1,1024], index: 6, kind: input, shape index: {}]   ;;  %s777_s7 = inlined_call_operand.hbm [shape: f32[2,1024], index: 7, kind: output, shape index: {}]  }
   0x1   :  { %13 = vsyncpa [#allocation6], 0 }
   0x2   :  { %14 = vsyncpa [#allocation9], 0  ;;  %s31_s26 = sshll.u32 %s771_s1, 4  ;;  %s32_s26 = int_to_ptr.hbm [resolvable:$true] %s31_s26 }
   0x3   :  { %15 = vsyncpa [#allocation4], 0  ;;  %s690_s27 = smov [#allocation5]   ;;  %s61_s8 = sshll.u32 %s775_s5, 4  ;;  %s62_s8 = int_to_ptr.hbm [resolvable:$true] %s61_s8 }
   0x4   :  { %s33_s28 = sshll.u32 %s690_s27, 4  ;;  %s691_s9 = smov 128   ;;  %s34_s28 = int_to_ptr.vmem [resolvable:$true] %s33_s28 }
   0x5   :  { %s692_s10 = smov 8   ;;  %s693_s11 = smov [#allocation8]  }
   0x6   :  { %39 = dma.hbm_to_vmem [thread:$0]  %s32_s26, 512, %s34_s28, [#allocation6], %s691_s9, %s691_s9, %s692_s10  }
   0x7   :  { %s63_s12 = sshll.u32 %s693_s11, 4  ;;  %s694_s13 = smov 1024   ;;  %s64_s12 = int_to_ptr.vmem [resolvable:$true] %s63_s12 }
   0x8   :  { %s695_s14 = smov 64   ;;  %s21_s16 = sshll.u32 %s770_s0, 4  ;;  %s22_s16 = int_to_ptr.hbm [resolvable:$true] %s21_s16 }
   0x9   :  { %69 = dma.hbm_to_vmem [thread:$0]  %s62_s8, 16384, %s64_s12, [#allocation9], %s694_s13, %s694_s13, %s695_s14  }
   0xa   :  { %s696_s17 = smov [#allocation2]   ;;  %s46_s20 = sshll.u32 %s773_s3, 4  ;;  %s47_s20 = int_to_ptr.hbm [resolvable:$true] %s46_s20 }
   0xb   :  { %s23_s18 = sshll.u32 %s696_s17, 4  ;;  %s697_s21 = smov [#allocation7]   ;;  %s24_s18 = int_to_ptr.vmem [resolvable:$true] %s23_s18 }
   0xc   :  { %26 = dma.hbm_to_vmem [thread:$0]  %s22_s16, 32, %s24_s18, [#allocation3]  }
   0xd   :  { %s48_s22 = sshll.u32 %s697_s21, 4  ;;  %s75_s25 = sshll.u32 %s776_s6, 4  ;;  %s49_s22 = int_to_ptr.vmem [resolvable:$true] %s48_s22  ;;  %s76_s25 = int_to_ptr.hbm [resolvable:$true] %s75_s25 }
   0xe   :  { %54 = dma.hbm_to_vmem [thread:$0]  %s47_s20, 1024, %s49_s22, [#allocation6], %s691_s9, %s691_s9, %s692_s10  }
   0xf   :  { %s698_s0 = smov [#allocation10]  }
  0x10   :  { %s77_s26 = sshll.u32 %s698_s0, 4  ;;  %s78_s26 = int_to_ptr.vmem [resolvable:$true] %s77_s26 }
  0x11   :  { %80 = dma.hbm_to_vmem [thread:$0]  %s76_s25, 128, %s78_s26, [#allocation9]  }
  0x12   :  { %682 = dma.done.wait [#allocation3], 32  }
  0x13   :  { %683 = vsyncadd [#allocation3], 4294967264 }
  0x14   :  { %684 = dma.done.wait [#allocation6], 1536  }
  0x15   :  { %685 = vsyncadd [#allocation6], 4294965760 }
  0x16   :  { %686 = dma.done.wait [#allocation9], 16512  }
  0x17   :  { %687 = vsyncadd [#allocation9], 4294950784  ;;  %v105_v0 = vld [vmem:[#allocation5 + $0x18] sm:$0xff]  ;;  %v104_v1 = vld [vmem:[#allocation5 + $0x10] sm:$0xff]  ;;  %vm110_vm0 = vcmask 261120   ;;  %vm147_vm1 = vcmask 523264  }
  0x18   :  { %126 = vmatpush.msra.mxu0 %v105_v0  ;;  %v142_v2 = vld [vmem:[#allocation7 + $0x38] sm:$0xff]  ;;  %v103_v3 = vld [vmem:[#allocation5 + $0x8] sm:$0xff]  ;;  %v141_v4 = vld [vmem:[#allocation7 + $0x30] sm:$0xff]  ;;  %vm494_vm2 = vcmask 1045508   ;;  %vm492_vm3 = vcmask 1041408   ;;  %vm496_vm4 = vcmask 1043456  }
  0x19   :  { %159 = vmatpush.msra.mxu1 %v142_v2  ;;  %v140_v5 = vld [vmem:[#allocation7 + $0x28] sm:$0xff]  ;;  %v102_v6 = vld [vmem:[#allocation5] sm:$0xff]  ;;  %v101_v7 = vld [vmem:[#allocation2] sm:$0x3]  ;;  %s512_s8 = sshll.u32 %s777_s7, 4  ;;  %s513_s8 = int_to_ptr.hbm [resolvable:$true] %s512_s8 }
  0x1a   :  { %127 = vmatpush.msra.mxu0 %v104_v1  ;;  %v139_v8 = vld [vmem:[#allocation7 + $0x20] sm:$0xff]  ;;  %v138_v9 = vld [vmem:[#allocation7 + $0x18] sm:$0xff]  ;;  %v137_v10 = vld [vmem:[#allocation7 + $0x10] sm:$0xff] }
  0x1b   :  { %160 = vmatpush.msra.mxu1 %v141_v4  ;;  %v136_v11 = vld [vmem:[#allocation7 + $0x8] sm:$0xff]  ;;  %v135_v12 = vld [vmem:[#allocation7] sm:$0xff]  ;;  %v294_v15 = vld [vmem:[#allocation8 + $0x3d0] sm:$0xff] }
  0x1c   :  { %128 = vmatpush.msra.mxu0 %v103_v3  ;;  %v292_v13 = vld [vmem:[#allocation8 + $0x3c0] sm:$0xff]  ;;  %v293_v14 = vld [vmem:[#allocation8 + $0x3c8] sm:$0xff]  ;;  %v295_v16 = vld [vmem:[#allocation8 + $0x3d8] sm:$0xff] }
  0x1d   :  { %161 = vmatpush.msra.mxu1 %v140_v5  ;;  %318 = vmatpush.msra.mxu2 %v292_v13  ;;  %v284_v17 = vld [vmem:[#allocation8 + $0x380] sm:$0xff]  ;;  %v285_v18 = vld [vmem:[#allocation8 + $0x388] sm:$0xff]  ;;  %v286_v19 = vld [vmem:[#allocation8 + $0x390] sm:$0xff] }
  0x1e   :  { %129 = vmatpush.msra.mxu0 %v102_v6  ;;  %338 = vmatpush.msra.mxu3 %v293_v14  ;;  %v287_v20 = vld [vmem:[#allocation8 + $0x398] sm:$0xff]  ;;  %v276_v21 = vld [vmem:[#allocation8 + $0x340] sm:$0xff]  ;;  %v277_v22 = vld [vmem:[#allocation8 + $0x348] sm:$0xff] }
  0x1f   :  { %524 = vmatmul.msk.f32.vlgmr.msra.gmra.mxu0 %vm110_vm0, %v101_v7  ;;  %162 = vmatpush.msra.mxu1 %v139_v8  ;;  %v278_v23 = vld [vmem:[#allocation8 + $0x350] sm:$0xff]  ;;  %v279_v24 = vld [vmem:[#allocation8 + $0x358] sm:$0xff]  ;;  %v268_v25 = vld [vmem:[#allocation8 + $0x300] sm:$0xff] }
  0x20   :  { %358 = vmatpush.msrb.mxu0 %v294_v15  ;;  %319 = vmatpush.msra.mxu2 %v284_v17  ;;  %v269_v26 = vld [vmem:[#allocation8 + $0x308] sm:$0xff]  ;;  %v270_v27 = vld [vmem:[#allocation8 + $0x310] sm:$0xff]  ;;  %v271_v28 = vld [vmem:[#allocation8 + $0x318] sm:$0xff] }
  0x21   :  { %163 = vmatpush.msra.mxu1 %v138_v9  ;;  %339 = vmatpush.msra.mxu3 %v285_v18  ;;  %v260_v29 = vld [vmem:[#allocation8 + $0x2c0] sm:$0xff]  ;;  %v261_v30 = vld [vmem:[#allocation8 + $0x2c8] sm:$0xff]  ;;  %v262_v31 = vld [vmem:[#allocation8 + $0x2d0] sm:$0xff] }
  0x22   :  { %359 = vmatpush.msrb.mxu0 %v286_v19  ;;  %320 = vmatpush.msra.mxu2 %v276_v21  ;;  %v263_v32 = vld [vmem:[#allocation8 + $0x2d8] sm:$0xff]  ;;  %v252_v33 = vld [vmem:[#allocation8 + $0x280] sm:$0xff]  ;;  %v253_v34 = vld [vmem:[#allocation8 + $0x288] sm:$0xff] }
  0x23   :  { %164 = vmatpush.msra.mxu1 %v137_v10  ;;  %340 = vmatpush.msra.mxu3 %v277_v22  ;;  %v254_v35 = vld [vmem:[#allocation8 + $0x290] sm:$0xff]  ;;  %v255_v36 = vld [vmem:[#allocation8 + $0x298] sm:$0xff]  ;;  %v244_v37 = vld [vmem:[#allocation8 + $0x240] sm:$0xff] }
  0x24   :  { %360 = vmatpush.msrb.mxu0 %v278_v23  ;;  %321 = vmatpush.msra.mxu2 %v268_v25  ;;  %v245_v38 = vld [vmem:[#allocation8 + $0x248] sm:$0xff]  ;;  %v246_v39 = vld [vmem:[#allocation8 + $0x250] sm:$0xff]  ;;  %v247_v40 = vld [vmem:[#allocation8 + $0x258] sm:$0xff] }
  0x25   :  { %165 = vmatpush.msra.mxu1 %v136_v11  ;;  %341 = vmatpush.msra.mxu3 %v269_v26  ;;  %v236_v41 = vld [vmem:[#allocation8 + $0x200] sm:$0xff]  ;;  %v237_v42 = vld [vmem:[#allocation8 + $0x208] sm:$0xff]  ;;  %v238_v43 = vld [vmem:[#allocation8 + $0x210] sm:$0xff] }
  0x26   :  { %361 = vmatpush.msrb.mxu0 %v270_v27  ;;  %322 = vmatpush.msra.mxu2 %v260_v29  ;;  %v239_v44 = vld [vmem:[#allocation8 + $0x218] sm:$0xff]  ;;  %v228_v45 = vld [vmem:[#allocation8 + $0x1c0] sm:$0xff]  ;;  %v229_v46 = vld [vmem:[#allocation8 + $0x1c8] sm:$0xff] }
  0x27   :  { %166 = vmatpush.msra.mxu1 %v135_v12  ;;  %342 = vmatpush.msra.mxu3 %v261_v30  ;;  %v230_v47 = vld [vmem:[#allocation8 + $0x1d0] sm:$0xff]  ;;  %v231_v48 = vld [vmem:[#allocation8 + $0x1d8] sm:$0xff]  ;;  %v220_v49 = vld [vmem:[#allocation8 + $0x180] sm:$0xff] }
  0x28   :  { %362 = vmatpush.msrb.mxu0 %v262_v31  ;;  %323 = vmatpush.msra.mxu2 %v252_v33  ;;  %v221_v50 = vld [vmem:[#allocation8 + $0x188] sm:$0xff]  ;;  %v222_v51 = vld [vmem:[#allocation8 + $0x190] sm:$0xff]  ;;  %v223_v52 = vld [vmem:[#allocation8 + $0x198] sm:$0xff] }
  0x29   :  { %378 = vmatpush.msrb.mxu1 %v295_v16  ;;  %343 = vmatpush.msra.mxu3 %v253_v34  ;;  %v212_v53 = vld [vmem:[#allocation8 + $0x140] sm:$0xff]  ;;  %v213_v54 = vld [vmem:[#allocation8 + $0x148] sm:$0xff]  ;;  %v214_v55 = vld [vmem:[#allocation8 + $0x150] sm:$0xff] }
  0x2a   :  { %363 = vmatpush.msrb.mxu0 %v254_v35  ;;  %324 = vmatpush.msra.mxu2 %v244_v37  ;;  %v215_v56 = vld [vmem:[#allocation8 + $0x158] sm:$0xff]  ;;  %v204_v57 = vld [vmem:[#allocation8 + $0x100] sm:$0xff]  ;;  %v205_v58 = vld [vmem:[#allocation8 + $0x108] sm:$0xff] }
  0x2b   :  { %379 = vmatpush.msrb.mxu1 %v287_v20  ;;  %344 = vmatpush.msra.mxu3 %v245_v38  ;;  %v206_v59 = vld [vmem:[#allocation8 + $0x110] sm:$0xff]  ;;  %v207_v60 = vld [vmem:[#allocation8 + $0x118] sm:$0xff]  ;;  %v196_v61 = vld [vmem:[#allocation8 + $0xc0] sm:$0xff] }
  0x2c   :  { %364 = vmatpush.msrb.mxu0 %v246_v39  ;;  %325 = vmatpush.msra.mxu2 %v236_v41  ;;  %v197_v62 = vld [vmem:[#allocation8 + $0xc8] sm:$0xff]  ;;  %v198_v63 = vld [vmem:[#allocation8 + $0xd0] sm:$0xff]  ;;  %v199_v0 = vld [vmem:[#allocation8 + $0xd8] sm:$0xff] }
  0x2d   :  { %380 = vmatpush.msrb.mxu1 %v279_v24  ;;  %345 = vmatpush.msra.mxu3 %v237_v42  ;;  %v536_v1 = vld [vmem:[%s772_s2] ss:$0 sm:$0xff]  ;;  %v188_v2 = vld [vmem:[#allocation8 + $0x80] sm:$0xff]  ;;  %v189_v3 = vld [vmem:[#allocation8 + $0x88] sm:$0xff] }
  0x2e   :  { %365 = vmatpush.msrb.mxu0 %v238_v43  ;;  %326 = vmatpush.msra.mxu2 %v228_v45  ;;  %v190_v4 = vld [vmem:[#allocation8 + $0x90] sm:$0xff]  ;;  %v191_v5 = vld [vmem:[#allocation8 + $0x98] sm:$0xff]  ;;  %v180_v6 = vld [vmem:[#allocation8 + $0x40] sm:$0xff] }
  0x2f   :  { %381 = vmatpush.msrb.mxu1 %v271_v28  ;;  %346 = vmatpush.msra.mxu3 %v229_v46  ;;  %v181_v7 = vld [vmem:[#allocation8 + $0x48] sm:$0xff]  ;;  %v182_v9 = vld [vmem:[#allocation8 + $0x50] sm:$0xff]  ;;  %v183_v10 = vld [vmem:[#allocation8 + $0x58] sm:$0xff] }
  0x30   :  { %366 = vmatpush.msrb.mxu0 %v230_v47  ;;  %327 = vmatpush.msra.mxu2 %v220_v49  ;;  %v172_v12 = vld [vmem:[#allocation8] sm:$0xff]  ;;  %v173_v13 = vld [vmem:[#allocation8 + $0x8] sm:$0xff]  ;;  %v174_v14 = vld [vmem:[#allocation8 + $0x10] sm:$0xff] }
  0x31   :  { %382 = vmatpush.msrb.mxu1 %v263_v32  ;;  %347 = vmatpush.msra.mxu3 %v221_v50  ;;  %v175_v16 = vld [vmem:[#allocation8 + $0x18] sm:$0xff]  ;;  %v296_v17 = vld [vmem:[#allocation8 + $0x3e0] sm:$0xff]  ;;  %v297_v18 = vld [vmem:[#allocation8 + $0x3e8] sm:$0xff] }
  0x32   :  { %367 = vmatpush.msrb.mxu0 %v222_v51  ;;  %328 = vmatpush.msra.mxu2 %v212_v53  ;;  %v298_v19 = vld [vmem:[#allocation8 + $0x3f0] sm:$0xff]  ;;  %v299_v20 = vld [vmem:[#allocation8 + $0x3f8] sm:$0xff]  ;;  %v288_v21 = vld [vmem:[#allocation8 + $0x3a0] sm:$0xff] }
  0x33   :  { %383 = vmatpush.msrb.mxu1 %v255_v36  ;;  %348 = vmatpush.msra.mxu3 %v213_v54  ;;  %v289_v22 = vld [vmem:[#allocation8 + $0x3a8] sm:$0xff]  ;;  %v290_v23 = vld [vmem:[#allocation8 + $0x3b0] sm:$0xff]  ;;  %v291_v24 = vld [vmem:[#allocation8 + $0x3b8] sm:$0xff] }
  0x34   :  { %368 = vmatpush.msrb.mxu0 %v214_v55  ;;  %329 = vmatpush.msra.mxu2 %v204_v57  ;;  %v280_v25 = vld [vmem:[#allocation8 + $0x360] sm:$0xff]  ;;  %v281_v26 = vld [vmem:[#allocation8 + $0x368] sm:$0xff]  ;;  %v282_v27 = vld [vmem:[#allocation8 + $0x370] sm:$0xff] }
  0x35   :  { %384 = vmatpush.msrb.mxu1 %v247_v40  ;;  %349 = vmatpush.msra.mxu3 %v205_v58  ;;  %v283_v28 = vld [vmem:[#allocation8 + $0x378] sm:$0xff]  ;;  %v272_v29 = vld [vmem:[#allocation8 + $0x320] sm:$0xff]  ;;  %v273_v30 = vld [vmem:[#allocation8 + $0x328] sm:$0xff] }
  0x36   :  { %369 = vmatpush.msrb.mxu0 %v206_v59  ;;  %330 = vmatpush.msra.mxu2 %v196_v61  ;;  %v274_v31 = vld [vmem:[#allocation8 + $0x330] sm:$0xff]  ;;  %v275_v32 = vld [vmem:[#allocation8 + $0x338] sm:$0xff]  ;;  %v264_v33 = vld [vmem:[#allocation8 + $0x2e0] sm:$0xff] }
  0x37   :  { %385 = vmatpush.msrb.mxu1 %v239_v44  ;;  %350 = vmatpush.msra.mxu3 %v197_v62  ;;  %v265_v34 = vld [vmem:[#allocation8 + $0x2e8] sm:$0xff]  ;;  %v266_v35 = vld [vmem:[#allocation8 + $0x2f0] sm:$0xff]  ;;  %v267_v36 = vld [vmem:[#allocation8 + $0x2f8] sm:$0xff] }
  0x38   :  { %370 = vmatpush.msrb.mxu0 %v198_v63  ;;  %331 = vmatpush.msra.mxu2 %v188_v2  ;;  %v256_v37 = vld [vmem:[#allocation8 + $0x2a0] sm:$0xff]  ;;  %v257_v38 = vld [vmem:[#allocation8 + $0x2a8] sm:$0xff]  ;;  %v258_v39 = vld [vmem:[#allocation8 + $0x2b0] sm:$0xff] }
  0x39   :  { %386 = vmatpush.msrb.mxu1 %v231_v48  ;;  %351 = vmatpush.msra.mxu3 %v189_v3  ;;  %v259_v40 = vld [vmem:[#allocation8 + $0x2b8] sm:$0xff]  ;;  %v248_v41 = vld [vmem:[#allocation8 + $0x260] sm:$0xff]  ;;  %v249_v42 = vld [vmem:[#allocation8 + $0x268] sm:$0xff] }
  0x3a   :  { %371 = vmatpush.msrb.mxu0 %v190_v4  ;;  %332 = vmatpush.msra.mxu2 %v180_v6  ;;  %v250_v43 = vld [vmem:[#allocation8 + $0x270] sm:$0xff]  ;;  %v251_v44 = vld [vmem:[#allocation8 + $0x278] sm:$0xff]  ;;  %v240_v45 = vld [vmem:[#allocation8 + $0x220] sm:$0xff] }
  0x3b   :  { %387 = vmatpush.msrb.mxu1 %v223_v52  ;;  %352 = vmatpush.msra.mxu3 %v181_v7  ;;  %v241_v46 = vld [vmem:[#allocation8 + $0x228] sm:$0xff]  ;;  %v242_v47 = vld [vmem:[#allocation8 + $0x230] sm:$0xff]  ;;  %v243_v48 = vld [vmem:[#allocation8 + $0x238] sm:$0xff] }
  0x3c   :  { %372 = vmatpush.msrb.mxu0 %v182_v9  ;;  %333 = vmatpush.msra.mxu2 %v172_v12  ;;  %v232_v49 = vld [vmem:[#allocation8 + $0x1e0] sm:$0xff]  ;;  %v233_v50 = vld [vmem:[#allocation8 + $0x1e8] sm:$0xff]  ;;  %v234_v51 = vld [vmem:[#allocation8 + $0x1f0] sm:$0xff] }
  0x3d   :  { %388 = vmatpush.msrb.mxu1 %v215_v56  ;;  %353 = vmatpush.msra.mxu3 %v173_v13  ;;  %v235_v52 = vld [vmem:[#allocation8 + $0x1f8] sm:$0xff]  ;;  %v224_v53 = vld [vmem:[#allocation8 + $0x1a0] sm:$0xff]  ;;  %v225_v54 = vld [vmem:[#allocation8 + $0x1a8] sm:$0xff] }
  0x3e   :  { %373 = vmatpush.msrb.mxu0 %v174_v14  ;;  %398 = vmatpush.msrb.mxu2 %v296_v17  ;;  %v226_v55 = vld [vmem:[#allocation8 + $0x1b0] sm:$0xff]  ;;  %v227_v56 = vld [vmem:[#allocation8 + $0x1b8] sm:$0xff]  ;;  %v216_v57 = vld [vmem:[#allocation8 + $0x160] sm:$0xff] }
  0x3f   :  { %389 = vmatpush.msrb.mxu1 %v207_v60  ;;  %418 = vmatpush.msrb.mxu3 %v297_v18  ;;  %v217_v58 = vld [vmem:[#allocation8 + $0x168] sm:$0xff]  ;;  %v218_v59 = vld [vmem:[#allocation8 + $0x170] sm:$0xff]  ;;  %v219_v60 = vld [vmem:[#allocation8 + $0x178] sm:$0xff] }
  0x40   :  { %438 = vmatpush.msra.mxu0 %v298_v19  ;;  %399 = vmatpush.msrb.mxu2 %v288_v21  ;;  %v208_v61 = vld [vmem:[#allocation8 + $0x120] sm:$0xff]  ;;  %v209_v62 = vld [vmem:[#allocation8 + $0x128] sm:$0xff]  ;;  %v210_v63 = vld [vmem:[#allocation8 + $0x130] sm:$0xff] }
  0x41   :  { %390 = vmatpush.msrb.mxu1 %v199_v0  ;;  %419 = vmatpush.msrb.mxu3 %v289_v22  ;;  %v211_v0 = vld [vmem:[#allocation8 + $0x138] sm:$0xff]  ;;  %v201_v2 = vld [vmem:[#allocation8 + $0xe8] sm:$0xff]  ;;  %v202_v3 = vld [vmem:[#allocation8 + $0xf0] sm:$0xff] }
  0x42   :  { %439 = vmatpush.msra.mxu0 %v290_v23  ;;  %400 = vmatpush.msrb.mxu2 %v280_v25  ;;  %v203_v4 = vld [vmem:[#allocation8 + $0xf8] sm:$0xff]  ;;  %v193_v6 = vld [vmem:[#allocation8 + $0xa8] sm:$0xff]  ;;  %v194_v7 = vld [vmem:[#allocation8 + $0xb0] sm:$0xff] }
  0x43   :  { %391 = vmatpush.msrb.mxu1 %v191_v5  ;;  %420 = vmatpush.msrb.mxu3 %v281_v26  ;;  %v192_v5 = vld [vmem:[#allocation8 + $0xa0] sm:$0xff]  ;;  %v187_v12 = vld [vmem:[#allocation8 + $0x78] sm:$0xff]  ;;  %v177_v14 = vld [vmem:[#allocation8 + $0x28] sm:$0xff] }
  0x44   :  { %440 = vmatpush.msra.mxu0 %v282_v27  ;;  %401 = vmatpush.msrb.mxu2 %v272_v29  ;;  %v184_v9 = vld [vmem:[#allocation8 + $0x60] sm:$0xff]  ;;  %v537_v17 = vld [vmem:[%s774_s4] ss:$0 sm:$0xff]  ;;  %s699_s4 = smov [#allocation11]  }
  0x45   :  { %392 = vmatpush.msrb.mxu1 %v183_v10  ;;  %421 = vmatpush.msrb.mxu3 %v273_v30  ;;  %v185_v10 = vld [vmem:[#allocation8 + $0x68] sm:$0xff]  ;;  %v176_v13 = vld [vmem:[#allocation8 + $0x20] sm:$0xff]  ;;  %s510_s28 = sshll.u32 %s699_s4, 4  ;;  %s511_s28 = int_to_ptr.vmem [resolvable:$true] %s510_s28 }
  0x46   :  { %441 = vmatpush.msra.mxu0 %v274_v31  ;;  %402 = vmatpush.msrb.mxu2 %v264_v33  ;;  %v300_v21 = vld [vmem:[#allocation10] sm:$0xff] }
  0x47   :  { %393 = vmatpush.msrb.mxu1 %v175_v16  ;;  %422 = vmatpush.msrb.mxu3 %v265_v34  ;;  %v179_v16 = vld [vmem:[#allocation8 + $0x38] sm:$0xff]  ;;  %v304_v22 = vperm.slane %v300_v21, 2  ;;  %v305_v23 = vperm.slane %v300_v21, 3  ;;  %v302_v29 = vperm.slane %v300_v21, 0 }
  0x48   :  { %442 = vmatpush.msra.mxu0 %v266_v35  ;;  %403 = vmatpush.msrb.mxu2 %v256_v37 }
  0x49   :  { %423 = vmatpush.msrb.mxu3 %v257_v38 }
  0x4a   :  { %443 = vmatpush.msra.mxu0 %v258_v39  ;;  %404 = vmatpush.msrb.mxu2 %v248_v41  ;;  %v307_v41 = vperm.slane %v300_v21, 5 }
  0x4b   :  { %424 = vmatpush.msrb.mxu3 %v249_v42 }
  0x4c   :  { %444 = vmatpush.msra.mxu0 %v250_v43  ;;  %405 = vmatpush.msrb.mxu2 %v240_v45 }
  0x4d   :  { %425 = vmatpush.msrb.mxu3 %v241_v46 }
  0x4e   :  { %445 = vmatpush.msra.mxu0 %v242_v47  ;;  %406 = vmatpush.msrb.mxu2 %v232_v49  ;;  %v306_v47 = vperm.slane %v300_v21, 4 }
  0x4f   :  { %426 = vmatpush.msrb.mxu3 %v233_v50 }
  0x50   :  { %446 = vmatpush.msra.mxu0 %v234_v51  ;;  %407 = vmatpush.msrb.mxu2 %v224_v53 }
  0x51   :  { %427 = vmatpush.msrb.mxu3 %v225_v54 }
  0x52   :  { %447 = vmatpush.msra.mxu0 %v226_v55  ;;  %408 = vmatpush.msrb.mxu2 %v216_v57 }
  0x53   :  { %428 = vmatpush.msrb.mxu3 %v217_v58 }
  0x54   :  { %448 = vmatpush.msra.mxu0 %v218_v59  ;;  %409 = vmatpush.msrb.mxu2 %v208_v61 }
  0x55   :  { %429 = vmatpush.msrb.mxu3 %v209_v62 }
  0x56   :  { %449 = vmatpush.msra.mxu0 %v210_v63 }
  0x57   :  { %430 = vmatpush.msrb.mxu3 %v201_v2 }
  0x58   :  { %450 = vmatpush.msra.mxu0 %v202_v3 }
  0x59   :  { %431 = vmatpush.msrb.mxu3 %v193_v6 }
  0x5a   :  { %451 = vmatpush.msra.mxu0 %v194_v7 }
  0x5b   :  { %432 = vmatpush.msrb.mxu3 %v185_v10 }
  0x5d   :  { %433 = vmatpush.msrb.mxu3 %v177_v14 }
  0x9c   :  { %v131_v8 = vpop.f32.mrf.mxu0 }
  0x9d   :  { %v132_v11 = vadd.f32 %v536_v1, %v131_v8  ;;  %v200_v1 = vld [vmem:[#allocation8 + $0xe0] sm:$0xff]  ;;  %v195_v8 = vld [vmem:[#allocation8 + $0xb8] sm:$0xff] }
  0x9e   :  { %410 = vmatpush.msrb.mxu2 %v200_v1 }
  0x9f   :  { %v134_v15 = vmax.f32 %v132_v11, 0.0  ;;  %v186_v11 = vld [vmem:[#allocation8 + $0x70] sm:$0xff] }
  0xa0   :  { %411 = vmatpush.msrb.mxu2 %v192_v5  ;;  %452 = vmatpush.msra.mxu0 %v186_v11 }
  0xa1   :  { %525 = vmatmul.msk.f32.vlgmr.msra.gmra.mxu1 %vm147_vm1, %v134_v15  ;;  %v178_v15 = vld [vmem:[#allocation8 + $0x30] sm:$0xff] }
  0xa2   :  { %458 = vmatpush.msra.mxu1 %v299_v20  ;;  %412 = vmatpush.msrb.mxu2 %v184_v9 }
  0xa3   :  { %453 = vmatpush.msra.mxu0 %v178_v15 }
  0xa4   :  { %459 = vmatpush.msra.mxu1 %v291_v24  ;;  %413 = vmatpush.msrb.mxu2 %v176_v13 }
  0xa6   :  { %460 = vmatpush.msra.mxu1 %v283_v28  ;;  %v303_v28 = vperm.slane %v300_v21, 1 }
  0xa8   :  { %461 = vmatpush.msra.mxu1 %v275_v32  ;;  %v308_v32 = vperm.slane %v300_v21, 6 }
  0xaa   :  { %462 = vmatpush.msra.mxu1 %v267_v36  ;;  %v309_v36 = vperm.slane %v300_v21, 7 }
  0xac   :  { %463 = vmatpush.msra.mxu1 %v259_v40 }
  0xae   :  { %464 = vmatpush.msra.mxu1 %v251_v44 }
  0xb0   :  { %465 = vmatpush.msra.mxu1 %v243_v48 }
  0xb2   :  { %466 = vmatpush.msra.mxu1 %v235_v52 }
  0xb4   :  { %467 = vmatpush.msra.mxu1 %v227_v56 }
  0xb6   :  { %468 = vmatpush.msra.mxu1 %v219_v60 }
  0xb8   :  { %469 = vmatpush.msra.mxu1 %v211_v0 }
  0xba   :  { %470 = vmatpush.msra.mxu1 %v203_v4 }
  0xbc   :  { %471 = vmatpush.msra.mxu1 %v195_v8 }
  0xbe   :  { %472 = vmatpush.msra.mxu1 %v187_v12 }
  0xc0   :  { %473 = vmatpush.msra.mxu1 %v179_v16 }
 0x11e   :  { %v168_v18 = vpop.f32.mrf.mxu1 }
 0x11f   :  { %v169_v19 = vadd.f32 %v537_v17, %v168_v18 }
 0x121   :  { %v171_v20 = vmax.f32 %v169_v19, 0.0 }
 0x123   :  { %334 = vmatmul.f32.vlgmr.msra.gmra.mxu2 %v171_v20  ;;  %354 = vmatmul.f32.vlgmr.msra.gmra.mxu3 %v171_v20 }
 0x124   :  { %374 = vmatmul.f32.vlgmr.msrb.gmra.mxu0 %v171_v20  ;;  %394 = vmatmul.f32.vlgmr.msrb.gmra.mxu1 %v171_v20 }
 0x12b   :  { %414 = vmatmul.f32.vlgmr.msrb.gmra.mxu2 %v171_v20  ;;  %434 = vmatmul.f32.vlgmr.msrb.gmra.mxu3 %v171_v20 }
 0x12c   :  { %454 = vmatmul.f32.vlgmr.msra.gmra.mxu0 %v171_v20  ;;  %474 = vmatmul.f32.vlgmr.msra.gmra.mxu1 %v171_v20 }
 0x1a1   :  { %v375_v24 = vpop.f32.mrf.mxu0  ;;  %v395_v25 = vpop.f32.mrf.mxu1 }
 0x1a2   :  { %v376_v26 = vadd.f32 %v375_v24, %v304_v22  ;;  %v396_v27 = vadd.f32 %v395_v25, %v305_v23 }
 0x1a4   :  { %v487_v33 = vrot.slane %v376_v26, 4  ;;  %v488_v34 = vrot.slane %v396_v27, 2 }
 0x1a6   :  { %v335_v30 = vpop.f32.mrf.mxu2  ;;  %v355_v31 = vpop.f32.mrf.mxu3  ;;  %v495_v42 = vsel %vm494_vm2, %v487_v33, %v488_v34 }
 0x1a7   :  { %v356_v35 = vadd.f32 %v355_v31, %v303_v28  ;;  %v336_v37 = vadd.f32 %v335_v30, %v302_v29 }
 0x1a9   :  { %v486_v38 = vrot.slane %v356_v35, 6  ;;  %v455_v39 = vpop.f32.mrf.mxu0  ;;  %v475_v40 = vpop.f32.mrf.mxu1 }
 0x1aa   :  { %v456_v44 = vadd.f32 %v455_v39, %v308_v32  ;;  %v476_v45 = vadd.f32 %v475_v40, %v309_v36 }
 0x1ab   :  { %v493_v43 = vsel %vm492_vm3, %v336_v37, %v486_v38 }
 0x1ac   :  { %v497_v46 = vsel %vm496_vm4, %v493_v43, %v495_v42  ;;  %v490_v50 = vrot.slane %v456_v44, 4  ;;  %v491_v51 = vrot.slane %v476_v45, 2 }
 0x1ad   :  { %503 = vst [vmem:[#allocation11] sm:$0xff] %v497_v46 }
 0x1ae   :  { %v415_v48 = vpop.f32.mrf.mxu2  ;;  %v435_v49 = vpop.f32.mrf.mxu3  ;;  %v499_v55 = vsel %vm494_vm2, %v490_v50, %v491_v51 }
 0x1af   :  { %v436_v52 = vadd.f32 %v435_v49, %v307_v41  ;;  %v416_v53 = vadd.f32 %v415_v48, %v306_v47 }
 0x1b1   :  { %v489_v54 = vrot.slane %v436_v52, 6 }
 0x1b3   :  { %v498_v56 = vsel %vm492_vm3, %v416_v53, %v489_v54 }
 0x1b4   :  { %v500_v57 = vsel %vm496_vm4, %v498_v56, %v499_v55 }
 0x1b5   :  { %504 = vst [vmem:[#allocation11 + $0x8] sm:$0xff] %v500_v57 }
 0x1b6   :  { %515 = dma.vmem_to_hbm [thread:$0]  %s511_s28, 256, %s513_s8, [#allocation4]  }
 0x1b7   :  { %688 = dma.done.wait [#allocation4], 256  }
 0x1b8   :  { %689 = vsyncadd [#allocation4], 4294967040 }
 0x1b9   :  { %520 = vsyncpa [#allocation3], 1 }
 0x1ba   :  { %521 = vsyncpa [#allocation6], 1 }
 0x1bb   :  { %522 = vsyncpa [#allocation9], 1 }
 0x1bc   :  { %523 = vsyncpa [#allocation4], 1 }

</bundles_post_ra>
